<compile_context>
chip_gen: v7x
topology: tpu7x:2x2x1
jax: 0.10.0
libtpu: 0.0.40
codegen_flags: <defaults>
</compile_context>

<pallas_src>
import jax
import jax.numpy as jnp
from jax.experimental import pallas as pl
from jax.experimental.pallas import tpu as pltpu


def _round_up(x, m):
    return ((x + m - 1) // m) * m


# ---------------------------------------------------------------------------
# Kernel
# ---------------------------------------------------------------------------
def dqn_kernel(x_ref, w_ref, b_ref, o_ref, h1_ref, h2_ref):
    # x_ref : (TB, S)            batch tile of states (S = state_size, unpadded)
    # w_ref : (3, P, P)          zero-padded W1/W2/W3, stored (in, out), P = 128
    # b_ref : (8, P)             rows 0..2 hold b1/b2/b3, rest zero
    # o_ref : (TB, P)            lane-dense padded output, valid cols [:action_size]
    # h1/h2 : (TB, P)            VMEM scratch for activations
    x = x_ref[...]                                  # (TB, S)
    s = x.shape[1]

    # Layer 1: only the first S rows of the padded W1 can be non-zero, so a
    # static (S, P) slice of the resident slab gives an exact result.
    w1 = w_ref[0, :s, :]                            # (S, P) static slice
    h1 = jnp.dot(x, w1, preferred_element_type=jnp.float32) + b_ref[0:1, :]
    h1_ref[...] = jnp.maximum(h1, 0.0)

    # Layer 2 (padded rows/cols of W2 are zero, so the full-tile dot is exact).
    h2 = jnp.dot(h1_ref[...], w_ref[1],
                 preferred_element_type=jnp.float32) + b_ref[1:2, :]
    h2_ref[...] = jnp.maximum(h2, 0.0)

    # Layer 3: lane-dense (TB, P) store; cols >= action_size are exactly zero.
    out = jnp.dot(h2_ref[...], w_ref[2],
                  preferred_element_type=jnp.float32) + b_ref[2:3, :]
    o_ref[...] = out.astype(o_ref.dtype)


# ---------------------------------------------------------------------------
# Parameter packing (done once, outside the kernel)
# ---------------------------------------------------------------------------
def pack_params(params, state_size, hidden_size, action_size, pad):
    w_slab = jnp.zeros((3, pad, pad), jnp.float32)
    w_slab = w_slab.at[0, :state_size, :hidden_size].set(params["w1"])
    w_slab = w_slab.at[1, :hidden_size, :hidden_size].set(params["w2"])
    w_slab = w_slab.at[2, :hidden_size, :action_size].set(params["w3"])

    b_slab = jnp.zeros((8, pad), jnp.float32)
    b_slab = b_slab.at[0, :hidden_size].set(params["b1"].reshape(-1))
    b_slab = b_slab.at[1, :hidden_size].set(params["b2"].reshape(-1))
    b_slab = b_slab.at[2, :action_size].set(params["b3"].reshape(-1))
    return w_slab, b_slab


# ---------------------------------------------------------------------------
# Forward wrapper
# ---------------------------------------------------------------------------
def dqn_forward(x, params, *, block_rows=512):
    """x: (batch, state_size) f32. params: dict of (in,out) weights / (1,out) biases."""
    batch, state_size = x.shape
    hidden_size = params["w1"].shape[1]
    action_size = params["w3"].shape[1]

    # Lane padding target (all feature dims <= 128 for the stock DQN).
    pad = _round_up(max(state_size, hidden_size, action_size), 128)

    # Batch tile: big enough to amortize the ~0.35us/step overhead, small enough
    # for tiny test batches. Multiple of 8 (sublane rule) and well under v7x's
    # 32 MiB scoped VMEM even with double-buffering of the streamed blocks.
    tb = min(block_rows, _round_up(batch, 8))
    batch_pad = _round_up(batch, tb)
    if batch_pad != batch:
        x = jnp.pad(x, ((0, batch_pad - batch), (0, 0)))
    grid = (batch_pad // tb,)

    w_slab, b_slab = pack_params(params, state_size, hidden_size, action_size, pad)

    flops = 2 * batch_pad * (state_size * hidden_size
                             + hidden_size * hidden_size
                             + hidden_size * action_size)
    bytes_accessed = 4 * (batch_pad * state_size          # x in
                          + batch_pad * pad               # padded out
                          + w_slab.size + b_slab.size)    # params (read once)

    out = pl.pallas_call(
        dqn_kernel,
        out_shape=jax.ShapeDtypeStruct((batch_pad, pad), jnp.float32),
        grid_spec=pltpu.PrefetchScalarGridSpec(
            num_scalar_prefetch=0,
            grid=grid,
            in_specs=[
                pl.BlockSpec((tb, state_size), lambda i: (i, 0)),      # x: streamed
                pl.BlockSpec((3, pad, pad), lambda i: (0, 0, 0)),      # weights: resident
                pl.BlockSpec((8, pad), lambda i: (0, 0)),              # biases: resident
            ],
            out_specs=pl.BlockSpec((tb, pad), lambda i: (i, 0)),       # lane-dense out
            scratch_shapes=[
                pltpu.VMEM((tb, pad), jnp.float32),                    # h1
                pltpu.VMEM((tb, pad), jnp.float32),                    # h2
            ],
        ),
        compiler_params=pltpu.CompilerParams(
            dimension_semantics=("parallel",),                         # megacore on v7x
        ),
        cost_estimate=pl.CostEstimate(
            flops=flops, transcendentals=0, bytes_accessed=bytes_accessed),
    )(x, w_slab, b_slab)

    return out[:batch, :action_size]


# ---------------------------------------------------------------------------
# Init + reference
# ---------------------------------------------------------------------------
def init_params(key, state_size=9, action_size=9, hidden_size=64):
    """Deterministic synthetic init mimicking nn.Linear's U(-1/sqrt(fan_in), 1/sqrt(fan_in))."""
    ks = jax.random.split(key, 6)

    def linear(kw, kb, fan_in, fan_out):
        bound = 1.0 / jnp.sqrt(jnp.float32(fan_in))
        # Stored as (in, out) (transpose of PyTorch's (out, in)), so y = x @ W + b.
        w = jax.random.uniform(kw, (fan_in, fan_out), jnp.float32, -bound, bound)
        b = jax.random.uniform(kb, (1, fan_out), jnp.float32, -bound, bound)
        return w, b

    w1, b1 = linear(ks[0], ks[1], state_size, hidden_size)
    w2, b2 = linear(ks[2], ks[3], hidden_size, hidden_size)
    w3, b3 = linear(ks[4], ks[5], hidden_size, action_size)
    return {"w1": w1, "b1": b1, "w2": w2, "b2": b2, "w3": w3, "b3": b3}


def reference_forward(x, params):
    h1 = jnp.maximum(x @ params["w1"] + params["b1"], 0.0)
    h2 = jnp.maximum(h1 @ params["w2"] + params["b2"], 0.0)
    return h2 @ params["w3"] + params["b3"]


if __name__ == "__main__":
    key = jax.random.PRNGKey(0)
    k_params, k_x, k_x2 = jax.random.split(key, 3)

    state_size, action_size, hidden_size = 9, 9, 64
    batch = 8

    params = init_params(k_params, state_size, action_size, hidden_size)
    x = jax.random.normal(k_x, (batch, state_size), jnp.float32)

    out = dqn_forward(x, params)
    out = jax.block_until_ready(out)

    ref = reference_forward(x, params)
    assert out.shape == (batch, action_size)
    assert jnp.allclose(out, ref, atol=1e-5, rtol=1e-5)

    # Extra check: non-multiple-of-8 batch exercises the padding path.
    x2 = jax.random.normal(k_x2, (37, state_size), jnp.float32)
    out2 = jax.block_until_ready(dqn_forward(x2, params))
    ref2 = reference_forward(x2, params)
    assert out2.shape == (37, action_size)
    assert jnp.allclose(out2, ref2, atol=1e-5, rtol=1e-5)

    print("KERNEL_OK")
</pallas_src>

<mosaic_0001>
module attributes {stable_mosaic.version = 11 : i64} {
  func.func @dqn_kernel(%arg0: i32, %arg1: memref<8x9xf32, #tpu.memory_space<vmem>>, %arg2: memref<3x128x128xf32, #tpu.memory_space<vmem>>, %arg3: memref<8x128xf32, #tpu.memory_space<vmem>>, %arg4: memref<8x128xf32, #tpu.memory_space<vmem>>, %arg5: memref<8x128xf32, #tpu.memory_space<vmem>>, %arg6: memref<8x128xf32, #tpu.memory_space<vmem>>) attributes {dimension_semantics = [#tpu.dimension_semantics<parallel>], iteration_bounds = array<i64: 1>, scalar_prefetch = 0 : i64, scratch_operands = 2 : i64, tpu.core_type = #tpu.core_type<tc>, window_params = [{transform_indices = @transform_0, window_bounds = array<i64: 8, 9>}, {pipeline_mode = #tpu.pipeline_mode<synchronous>, transform_indices = @transform_1, window_bounds = array<i64: 3, 128, 128>}, {pipeline_mode = #tpu.pipeline_mode<synchronous>, transform_indices = @transform_2, window_bounds = array<i64: 8, 128>}, {transform_indices = @transform_3, window_bounds = array<i64: 8, 128>}]} {
    %c0 = arith.constant 0 : index
    %c0_0 = arith.constant 0 : index
    %0 = vector.load %arg1[%c0, %c0_0] : memref<8x9xf32, #tpu.memory_space<vmem>>, vector<8x9xf32>
    %c0_1 = arith.constant 0 : index
    %c0_2 = arith.constant 0 : index
    %c0_3 = arith.constant 0 : index
    %1 = vector.load %arg2[%c0_1, %c0_2, %c0_3] : memref<3x128x128xf32, #tpu.memory_space<vmem>>, vector<1x9x128xf32>
    %2 = vector.shape_cast %1 : vector<1x9x128xf32> to vector<9x128xf32>
    %cst = arith.constant dense<0.000000e+00> : vector<8x128xf32>
    %3 = tpu.matmul %0, %2, %cst {dimension_numbers = #tpu.dot_dimension_numbers<[1], [0], [0], [1], [0, 0, 1, 1], [], []>} : vector<8x9xf32>, vector<9x128xf32>, vector<8x128xf32> -> vector<8x128xf32>
    %c0_4 = arith.constant 0 : index
    %c0_5 = arith.constant 0 : index
    %4 = vector.load %arg3[%c0_4, %c0_5] : memref<8x128xf32, #tpu.memory_space<vmem>>, vector<1x128xf32>
    %5 = vector.broadcast %4 : vector<1x128xf32> to vector<8x128xf32>
    %6 = arith.addf %3, %5 : vector<8x128xf32>
    %cst_6 = arith.constant 0.000000e+00 : f32
    %7 = vector.broadcast %cst_6 : f32 to vector<8x128xf32>
    %8 = arith.maximumf %6, %7 : vector<8x128xf32>
    %c0_7 = arith.constant 0 : index
    %c0_8 = arith.constant 0 : index
    %9 = vector.load %arg5[%c0_7, %c0_8] : memref<8x128xf32, #tpu.memory_space<vmem>>, vector<8x128xf32>
    tpu.vector_store %arg5[%c0_7, %c0_8], %8 {strides = array<i32>} : memref<8x128xf32, #tpu.memory_space<vmem>>, vector<8x128xf32>,
    %c0_9 = arith.constant 0 : index
    %c0_10 = arith.constant 0 : index
    %10 = vector.load %arg5[%c0_9, %c0_10] : memref<8x128xf32, #tpu.memory_space<vmem>>, vector<8x128xf32>
    %c1 = arith.constant 1 : index
    %c0_11 = arith.constant 0 : index
    %c0_12 = arith.constant 0 : index
    %11 = vector.load %arg2[%c1, %c0_11, %c0_12] : memref<3x128x128xf32, #tpu.memory_space<vmem>>, vector<1x128x128xf32>
    %12 = vector.shape_cast %11 : vector<1x128x128xf32> to vector<128x128xf32>
    %cst_13 = arith.constant dense<0.000000e+00> : vector<8x128xf32>
    %13 = tpu.matmul %10, %12, %cst_13 {dimension_numbers = #tpu.dot_dimension_numbers<[1], [0], [0], [1], [0, 0, 1, 1], [], []>} : vector<8x128xf32>, vector<128x128xf32>, vector<8x128xf32> -> vector<8x128xf32>
    %c1_14 = arith.constant 1 : index
    %c0_15 = arith.constant 0 : index
    %14 = vector.load %arg3[%c1_14, %c0_15] : memref<8x128xf32, #tpu.memory_space<vmem>>, vector<1x128xf32>
    %15 = vector.broadcast %14 : vector<1x128xf32> to vector<8x128xf32>
    %16 = arith.addf %13, %15 : vector<8x128xf32>
    %cst_16 = arith.constant 0.000000e+00 : f32
    %17 = vector.broadcast %cst_16 : f32 to vector<8x128xf32>
    %18 = arith.maximumf %16, %17 : vector<8x128xf32>
    %c0_17 = arith.constant 0 : index
    %c0_18 = arith.constant 0 : index
    %19 = vector.load %arg6[%c0_17, %c0_18] : memref<8x128xf32, #tpu.memory_space<vmem>>, vector<8x128xf32>
    tpu.vector_store %arg6[%c0_17, %c0_18], %18 {strides = array<i32>} : memref<8x128xf32, #tpu.memory_space<vmem>>, vector<8x128xf32>,
    %c0_19 = arith.constant 0 : index
    %c0_20 = arith.constant 0 : index
    %20 = vector.load %arg6[%c0_19, %c0_20] : memref<8x128xf32, #tpu.memory_space<vmem>>, vector<8x128xf32>
    %c2 = arith.constant 2 : index
    %c0_21 = arith.constant 0 : index
    %c0_22 = arith.constant 0 : index
    %21 = vector.load %arg2[%c2, %c0_21, %c0_22] : memref<3x128x128xf32, #tpu.memory_space<vmem>>, vector<1x128x128xf32>
    %22 = vector.shape_cast %21 : vector<1x128x128xf32> to vector<128x128xf32>
    %cst_23 = arith.constant dense<0.000000e+00> : vector<8x128xf32>
    %23 = tpu.matmul %20, %22, %cst_23 {dimension_numbers = #tpu.dot_dimension_numbers<[1], [0], [0], [1], [0, 0, 1, 1], [], []>} : vector<8x128xf32>, vector<128x128xf32>, vector<8x128xf32> -> vector<8x128xf32>
    %c2_24 = arith.constant 2 : index
    %c0_25 = arith.constant 0 : index
    %24 = vector.load %arg3[%c2_24, %c0_25] : memref<8x128xf32, #tpu.memory_space<vmem>>, vector<1x128xf32>
    %25 = vector.broadcast %24 : vector<1x128xf32> to vector<8x128xf32>
    %26 = arith.addf %23, %25 : vector<8x128xf32>
    %c0_26 = arith.constant 0 : index
    %c0_27 = arith.constant 0 : index
    %27 = vector.load %arg4[%c0_26, %c0_27] : memref<8x128xf32, #tpu.memory_space<vmem>>, vector<8x128xf32>
    tpu.vector_store %arg4[%c0_26, %c0_27], %26 {strides = array<i32>} : memref<8x128xf32, #tpu.memory_space<vmem>>, vector<8x128xf32>,
    return
  }
  func.func @transform_0(%arg0: i32) -> (i32, i32) {
    %c0_i32 = arith.constant 0 : i32
    %c0_i32_0 = arith.constant 0 : i32
    return %arg0, %c0_i32 : i32, i32
  }
  func.func @transform_1(%arg0: i32) -> (i32, i32, i32) {
    %c0_i32 = arith.constant 0 : i32
    %c0_i32_0 = arith.constant 0 : i32
    %c0_i32_1 = arith.constant 0 : i32
    %c0_i32_2 = arith.constant 0 : i32
    return %c0_i32, %c0_i32_0, %c0_i32_1 : i32, i32, i32
  }
  func.func @transform_2(%arg0: i32) -> (i32, i32) {
    %c0_i32 = arith.constant 0 : i32
    %c0_i32_0 = arith.constant 0 : i32
    %c0_i32_1 = arith.constant 0 : i32
    return %c0_i32, %c0_i32_0 : i32, i32
  }
  func.func @transform_3(%arg0: i32) -> (i32, i32) {
    %c0_i32 = arith.constant 0 : i32
    %c0_i32_0 = arith.constant 0 : i32
    return %arg0, %c0_i32 : i32, i32
  }
}

</mosaic_0001>

<bundles_post_ra>
// kernel: tpu_custom_call.1
= control target key start
LH: loop header
LB: loop body
LE: loop exit
PB: predicated region body
PF: predicated region fallthrough
CT: control target
= control target key end

     0   :  { %8 = vsyncpa [#allocation5], 0  ;;  %s718_s0 = inlined_call_operand.hbm [shape: f32[8,9], index: 0, kind: input, shape index: {}]   ;;  %s719_s1 = inlined_call_operand.hbm [shape: f32[3,128,128], index: 1, kind: input, shape index: {}]   ;;  %s720_s2 = inlined_call_operand.hbm [shape: f32[8,128], index: 2, kind: input, shape index: {}]   ;;  %s721_s3 = inlined_call_operand.hbm [shape: f32[8,128], index: 3, kind: output, shape index: {}]  }
   0x1   :  { %9 = vsyncpa [#allocation8], 0 }
   0x2   :  { %10 = vsyncpa [#allocation6], 0  ;;  %s620_s12 = smov [#allocation7]   ;;  %s526_s16 = scalar_lea.hbm %s719_s1, 6144 }
   0x3   :  { %s26_s13 = sshll.u32 %s620_s12, 4  ;;  %p527_p0 = scmp.ne.s32.totalorder %s719_s1, %s526_s16  ;;  %s27_s13 = int_to_ptr.vmem [resolvable:$true] %s26_s13 }
   0x4   :  { %p530_p1 = scmp.lt.u32.totalorder %s526_s16, %s719_s1 }
   0x6   :  { %p532_p2 = pnand %p530_p1, %p527_p0 }
   0x8   :  { %535 = shalt.err (!%p532_p2)
}
   0x9   :  { %s536_s21 = scalar_lea.vmem %s27_s13, 6144  ;;  %p541_p4 = scmp.lt.s32.totalorder %s27_s13, %s27_s13 }
   0xa   :  { %p537_p3 = scmp.ne.s32.totalorder %s27_s13, %s536_s21  ;;  %p542_p5 = scmp.lt.s32.totalorder %s536_s21, %s536_s21 }
   0xc   :  { %p543_p6 = por %p542_p5, %p541_p4 }
   0xe   :  { %p544_p7 = pnand %p543_p6, %p537_p3 }
  0x10   :  { %547 = shalt.err (!%p544_p7)
}
  0x11   :  { %s621_s22 = smov 128   ;;  %s622_s23 = smov 8  }
  0x12   :  { %32 = dma.hbm_to_vmem [thread:$0]  %s719_s1, 6144, %s27_s13, [#allocation8], %s621_s22, %s621_s22, %s622_s23  }
  0x13   :  { %s623_s26 = smov [#allocation4]   ;;  %s624_s28 = smov [#allocation9]  }
  0x14   :  { %s17_s27 = sshll.u32 %s623_s26, 4  ;;  %s39_s29 = sshll.u32 %s624_s28, 4  ;;  %s18_s27 = int_to_ptr.vmem [resolvable:$true] %s17_s27  ;;  %s40_s29 = int_to_ptr.vmem [resolvable:$true] %s39_s29 }
  0x15   :  { %s548_s5 = scalar_lea.hbm %s718_s0, 128 }
  0x16   :  { %p549_p8 = scmp.ne.s32.totalorder %s718_s0, %s548_s5  ;;  %p552_p9 = scmp.lt.u32.totalorder %s548_s5, %s718_s0 }
  0x18   :  { %p554_p10 = pnand %p552_p9, %p549_p8 }
  0x1a   :  { %557 = shalt.err (!%p554_p10)
}
  0x1b   :  { %s558_s1 = scalar_lea.vmem %s18_s27, 128  ;;  %p563_p12 = scmp.lt.s32.totalorder %s18_s27, %s18_s27 }
  0x1c   :  { %p559_p11 = scmp.ne.s32.totalorder %s18_s27, %s558_s1  ;;  %p564_p13 = scmp.lt.s32.totalorder %s558_s1, %s558_s1 }
  0x1e   :  { %p565_p0 = por %p564_p13, %p563_p12 }
  0x20   :  { %p566_p1 = pnand %p565_p0, %p559_p11 }
  0x22   :  { %569 = shalt.err (!%p566_p1)
}
  0x23   :  { %20 = dma.hbm_to_vmem [thread:$0]  %s718_s0, 128, %s18_s27, [#allocation5]  }
  0x24   :  { %s570_s14 = scalar_lea.hbm %s720_s2, 128 }
  0x25   :  { %p571_p2 = scmp.ne.s32.totalorder %s720_s2, %s570_s14  ;;  %p574_p3 = scmp.lt.u32.totalorder %s570_s14, %s720_s2 }
  0x27   :  { %p576_p4 = pnand %p574_p3, %p571_p2 }
  0x29   :  { %579 = shalt.err (!%p576_p4)
}
  0x2a   :  { %s580_s19 = scalar_lea.vmem %s40_s29, 128  ;;  %p585_p6 = scmp.lt.s32.totalorder %s40_s29, %s40_s29 }
  0x2b   :  { %p581_p5 = scmp.ne.s32.totalorder %s40_s29, %s580_s19  ;;  %p586_p7 = scmp.lt.s32.totalorder %s580_s19, %s580_s19 }
  0x2d   :  { %p587_p8 = por %p586_p7, %p585_p6 }
  0x2f   :  { %p588_p9 = pnand %p587_p8, %p581_p5 }
  0x31   :  { %591 = shalt.err (!%p588_p9)
}
  0x32   :  { %42 = dma.hbm_to_vmem [thread:$0]  %s720_s2, 128, %s40_s29, [#allocation8]  }
  0x33   :  { %614 = dma.done.wait [#allocation5], 128  }
  0x34   :  { %615 = vsyncadd [#allocation5], 4294967168 }
  0x35   :  { %616 = dma.done.wait [#allocation8], 6272  }
  0x36   :  { %617 = vsyncadd [#allocation8], 4294961024  ;;  %v625_v0 = vmov 0.0|0.0   ;;  %vm626_vm0 = vmmov 0   ;;  %v627_v1 = vmov 0.0   ;;  %vm64_vm1 = vcmask 1040384  }
  0x37   :  { %464 = vmatprep.subr.bf16.mxu0 %v625_v0  ;;  %468 = vmatprep.subr.bf16.mxu1 %v625_v0  ;;  %v53_v2 = vld [vmem:[#allocation7] sm:$0xff]  ;;  %v54_v3 = vld [vmem:[#allocation7 + $0x8] sm:$0x1]  ;;  %vm628_vm2 = vmmov 1   ;;  %v144_v7 = vld [vmem:[#allocation7 + $0x90] sm:$0xff]  ;;  %vm60_vm4 = vcmask 72704  }
  0x38   :  { %391 = vmatprep.mubr.msk.f32.mxu0 %vm626_vm0, %v627_v1  ;;  %426 = vmatprep.mubr.msk.f32.mxu1 %vm626_vm0, %v627_v1  ;;  %vm466_vm3 = vmpackc.low %vm64_vm1, %vm628_vm2  ;;  %v465_v4 = vpack.c.bf16 %v54_v3, %v53_v2  ;;  %v142_v5 = vld [vmem:[#allocation7 + $0x80] sm:$0xff]  ;;  %v143_v6 = vld [vmem:[#allocation7 + $0x88] sm:$0xff]  ;;  %s629_s2 = smov [#allocation10]  }
  0x39   :  { %v469_v8 = vpack.c.bf16 %v143_v6, %v142_v5  ;;  %v145_v9 = vld [vmem:[#allocation7 + $0x98] sm:$0xff]  ;;  %v146_v12 = vld [vmem:[#allocation7 + $0xa0] sm:$0xff]  ;;  %v147_v13 = vld [vmem:[#allocation7 + $0xa8] sm:$0xff]  ;;  %s335_s21 = sshll.u32 %s629_s2, 4  ;;  %s336_s21 = int_to_ptr.vmem [resolvable:$true] %s335_s21 }
  0x3a   :  { %467 = vmatpush3.bf16.msk.msra.mxu0 %vm466_vm3, %v465_v4  ;;  %v52_v10 = vld [vmem:[#allocation4] sm:$0xff]  ;;  %v472_v11 = vpack.c.bf16 %v145_v9, %v144_v7  ;;  %v475_v14 = vpack.c.bf16 %v147_v13, %v146_v12  ;;  %v148_v15 = vld [vmem:[#allocation7 + $0xb0] sm:$0xff]  ;;  %v150_v18 = vld [vmem:[#allocation7 + $0xc0] sm:$0xff]  ;;  %s592_s22 = scalar_lea.vmem %s336_s21, 128  ;;  %p597_p11 = scmp.lt.s32.totalorder %s336_s21, %s336_s21 }
  0x3b   :  { %470 = vmatpush3.bf16.msra.mxu1 %v469_v8  ;;  %492 = vmatprep.subr.bf16.mxu0 %v625_v0  ;;  %v149_v16 = vld [vmem:[#allocation7 + $0xb8] sm:$0xff]  ;;  %v151_v19 = vld [vmem:[#allocation7 + $0xc8] sm:$0xff]  ;;  %v152_v21 = vld [vmem:[#allocation7 + $0xd0] sm:$0xff]  ;;  %p593_p10 = scmp.ne.s32.totalorder %s336_s21, %s592_s22  ;;  %p598_p12 = scmp.lt.s32.totalorder %s592_s22, %s592_s22 }
  0x3c   :  { %471 = vmatprep.subr.bf16.mxu1 %v625_v0  ;;  %v478_v17 = vpack.c.bf16 %v149_v16, %v148_v15  ;;  %v481_v20 = vpack.c.bf16 %v151_v19, %v150_v18  ;;  %v153_v22 = vld [vmem:[#allocation7 + $0xd8] sm:$0xff]  ;;  %v154_v24 = vld [vmem:[#allocation7 + $0xe0] sm:$0xff]  ;;  %v155_v25 = vld [vmem:[#allocation7 + $0xe8] sm:$0xff] }
  0x3d   :  { %392 = vmatmul.mubr.msk.f32.vlgmr.msra.gmra.mrb[0].mxu0 %vm60_vm4, %v52_v10  ;;  %v484_v23 = vpack.c.bf16 %v153_v22, %v152_v21  ;;  %v487_v26 = vpack.c.bf16 %v155_v25, %v154_v24  ;;  %v156_v27 = vld [vmem:[#allocation7 + $0xf0] sm:$0xff]  ;;  %v157_v28 = vld [vmem:[#allocation7 + $0xf8] sm:$0xff]  ;;  %v237_v30 = vld [vmem:[#allocation7 + $0x100] sm:$0xff]  ;;  %p599_p13 = por %p598_p12, %p597_p11 }
  0x3e   :  { %461 = vmatprep.mubr.msk.f32.mxu0 %vm626_vm0, %v627_v1  ;;  %v490_v29 = vpack.c.bf16 %v157_v28, %v156_v27  ;;  %v238_v31 = vld [vmem:[#allocation7 + $0x108] sm:$0xff]  ;;  %v239_v32 = vld [vmem:[#allocation7 + $0x110] sm:$0xff]  ;;  %v240_v34 = vld [vmem:[#allocation7 + $0x118] sm:$0xff] }
  0x3f   :  { %473 = vmatpush3.bf16.msra.mxu1 %v472_v11  ;;  %v493_v33 = vpack.c.bf16 %v238_v31, %v237_v30  ;;  %v496_v35 = vpack.c.bf16 %v240_v34, %v239_v32  ;;  %v241_v36 = vld [vmem:[#allocation7 + $0x120] sm:$0xff]  ;;  %v242_v37 = vld [vmem:[#allocation7 + $0x128] sm:$0xff]  ;;  %v243_v39 = vld [vmem:[#allocation7 + $0x130] sm:$0xff]  ;;  %p600_p0 = pnand %p599_p13, %p593_p10 }
  0x40   :  { %474 = vmatprep.subr.bf16.mxu1 %v625_v0  ;;  %v499_v38 = vpack.c.bf16 %v242_v37, %v241_v36  ;;  %v244_v40 = vld [vmem:[#allocation7 + $0x138] sm:$0xff]  ;;  %v245_v42 = vld [vmem:[#allocation7 + $0x140] sm:$0xff]  ;;  %v246_v43 = vld [vmem:[#allocation7 + $0x148] sm:$0xff] }
  0x41   :  { %494 = vmatpush3.bf16.msra.mxu0 %v493_v33  ;;  %v502_v41 = vpack.c.bf16 %v244_v40, %v243_v39  ;;  %v505_v44 = vpack.c.bf16 %v246_v43, %v245_v42  ;;  %v247_v45 = vld [vmem:[#allocation7 + $0x150] sm:$0xff]  ;;  %v248_v46 = vld [vmem:[#allocation7 + $0x158] sm:$0xff]  ;;  %v249_v48 = vld [vmem:[#allocation7 + $0x160] sm:$0xff] }
  0x42   :  { %495 = vmatprep.subr.bf16.mxu0 %v625_v0  ;;  %v508_v47 = vpack.c.bf16 %v248_v46, %v247_v45  ;;  %v250_v49 = vld [vmem:[#allocation7 + $0x168] sm:$0xff]  ;;  %v345_v51 = vld [vmem:[#allocation9] ss:$0 sm:$0xff]  ;;  %v251_v56 = vld [vmem:[#allocation7 + $0x170] sm:$0xff] }
  0x43   :  { %476 = vmatpush3.bf16.msra.mxu1 %v475_v14  ;;  %v511_v50 = vpack.c.bf16 %v250_v49, %v249_v48  ;;  %v252_v57 = vld [vmem:[#allocation7 + $0x178] sm:$0xff]  ;;  %v348_v59 = vld [vmem:[#allocation9 + $0x1] ss:$0 sm:$0xff]  ;;  %v349_v1 = vld [vmem:[#allocation9 + $0x2] ss:$0 sm:$0xff] }
  0x44   :  { %477 = vmatprep.subr.bf16.mxu1 %v625_v0  ;;  %v514_v58 = vpack.c.bf16 %v252_v57, %v251_v56 }
  0x45   :  { %497 = vmatpush3.bf16.msra.mxu0 %v496_v35 }
  0x46   :  { %498 = vmatprep.subr.bf16.mxu0 %v625_v0 }
  0x47   :  { %479 = vmatpush3.bf16.msra.mxu1 %v478_v17 }
  0x48   :  { %480 = vmatprep.subr.bf16.mxu1 %v625_v0 }
  0x49   :  { %500 = vmatpush3.bf16.msra.mxu0 %v499_v38 }
  0x4a   :  { %501 = vmatprep.subr.bf16.mxu0 %v625_v0 }
  0x4b   :  { %482 = vmatpush3.bf16.msra.mxu1 %v481_v20 }
  0x4c   :  { %483 = vmatprep.subr.bf16.mxu1 %v625_v0 }
  0x4d   :  { %503 = vmatpush3.bf16.msra.mxu0 %v502_v41 }
  0x4e   :  { %504 = vmatprep.subr.bf16.mxu0 %v625_v0 }
  0x4f   :  { %485 = vmatpush3.bf16.msra.mxu1 %v484_v23 }
  0x50   :  { %486 = vmatprep.subr.bf16.mxu1 %v625_v0 }
  0x51   :  { %506 = vmatpush3.bf16.msra.mxu0 %v505_v44 }
  0x52   :  { %507 = vmatprep.subr.bf16.mxu0 %v625_v0 }
  0x53   :  { %488 = vmatpush3.bf16.msra.mxu1 %v487_v26 }
  0x54   :  { %489 = vmatprep.subr.bf16.mxu1 %v625_v0 }
  0x55   :  { %509 = vmatpush3.bf16.msra.mxu0 %v508_v47 }
  0x56   :  { %510 = vmatprep.subr.bf16.mxu0 %v625_v0 }
  0x57   :  { %491 = vmatpush3.bf16.msra.mxu1 %v490_v29 }
  0x59   :  { %512 = vmatpush3.bf16.msra.mxu0 %v511_v50 }
  0x5a   :  { %513 = vmatprep.subr.bf16.mxu0 %v625_v0 }
  0x5d   :  { %515 = vmatpush3.bf16.msra.mxu0 %v514_v58 }
 0x110   :  { %v134_v52 = vpop.f32.mrb[0].mxu0 }
 0x111   :  { %v135_v53 = vadd.f32 %v345_v51, %v134_v52  ;;  %v393_v54 = vpop.f32.mrb[1].mxu0 }
 0x113   :  { %v138_v55 = vmax.f32 %v135_v53, 0.0 }
 0x115   :  { %427 = vmatmul.mubr.f32.vlgmr.msra.gmra.mrb[0].mxu1 %v138_v55 }
 0x1e8   :  { %v229_v60 = vpop.f32.mrb[0].mxu1 }
 0x1e9   :  { %v230_v61 = vadd.f32 %v348_v59, %v229_v60  ;;  %v428_v62 = vpop.f32.mrb[1].mxu1 }
 0x1eb   :  { %v233_v63 = vmax.f32 %v230_v61, 0.0 }
 0x1ed   :  { %462 = vmatmul.mubr.f32.vlgmr.msra.gmra.mrb[2].mxu0 %v233_v63 }
 0x2c0   :  { %v324_v0 = vpop.f32.mrb[2].mxu0 }
 0x2c1   :  { %v325_v2 = vadd.f32 %v349_v1, %v324_v0  ;;  %v463_v3 = vpop.f32.mrb[3].mxu0 }
 0x2c3   :  { %328 = vst [vmem:[#allocation10] sm:$0xff] %v325_v2 }
 0x2c4   :  { %603 = shalt.err (!%p600_p0)
}
 0x2c5   :  { %s604_s25 = scalar_lea.hbm %s721_s3, 128 }
 0x2c6   :  { %p605_p1 = scmp.ne.s32.totalorder %s721_s3, %s604_s25  ;;  %p608_p2 = scmp.lt.u32.totalorder %s604_s25, %s721_s3 }
 0x2c8   :  { %p610_p3 = pnand %p608_p2, %p605_p1 }
 0x2ca   :  { %613 = shalt.err (!%p610_p3)
}
 0x2cb   :  { %338 = dma.vmem_to_hbm [thread:$0]  %s336_s21, 128, %s721_s3, [#allocation6]  }
 0x2cc   :  { %618 = dma.done.wait [#allocation6], 128  }
 0x2cd   :  { %619 = vsyncadd [#allocation6], 4294967168 }
 0x2ce   :  { %342 = vsyncpa [#allocation5], 1 }
 0x2cf   :  { %343 = vsyncpa [#allocation8], 1 }
 0x2d0   :  { %344 = vsyncpa [#allocation6], 1 }

</bundles_post_ra>
